<compile_context>
chip_gen: v7x
topology: tpu7x:2x2x1
jax: 0.10.0
libtpu: 0.0.40
codegen_flags: <defaults>
</compile_context>

<pallas_src>
import math

import jax
import jax.numpy as jnp
from jax.experimental import pallas as pl
from jax.experimental.pallas import tpu as pltpu

_IN = 1
_HIDDEN1 = 128   # fc1 out
_HIDDEN2 = 64    # fc2 out (zero-padded to 128 inside the kernel)
_OUT = 24        # fc3 out (stored narrow; fc3 N padded to 128 only for the MXU)
_PAD = 128       # MXU tile width


def _round_up(x, m):
    return ((x + m - 1) // m) * m


def _mlp_kernel(x_ref, w1_ref, b1_ref, w2_ref, b2_ref, w3_ref, b3_ref, o_ref):
    # fc1 (1 -> 128): K=1 contraction is an outer product -> VPU broadcast.
    # x_ref: (TB, 1); w1_ref/b1_ref: (1, 128) -> (TB, 128) float32.
    h1 = jnp.sin(x_ref[...] * w1_ref[...] + b1_ref[...])

    # fc2 (128 -> 128 padded) + relu on the MXU. Operands may be bf16
    # (f32 accumulate). Padded columns give relu(0 + 0) = 0 -> inert.
    h2 = jnp.maximum(
        jnp.dot(h1.astype(w2_ref.dtype), w2_ref[...],
                preferred_element_type=jnp.float32) + b2_ref[...],
        0.0,
    )

    # fc3 (128 padded -> 128 padded) on the MXU. Padded K rows are zero.
    z = jnp.dot(h2.astype(w3_ref.dtype), w3_ref[...],
                preferred_element_type=jnp.float32)

    # Only the 24 live lanes get bias + sigmoid and are stored (narrow,
    # lane-masked store: cuts HBM writeback ~10x vs. the padded 128-wide f32
    # block, and avoids wasting EUP sigmoid work on 104 dead columns).
    z24 = z[:, :_OUT] + b3_ref[...]
    o_ref[...] = jax.nn.sigmoid(z24).astype(o_ref.dtype)


def _prepare_params(params, *, mxu_bf16=True):
    """Pad fc2/fc3 to full MXU tiles; done once at init, not per call."""
    w1, b1, w2, b2, w3, b3 = params
    mdt = jnp.bfloat16 if mxu_bf16 else jnp.float32
    w2p = (jnp.zeros((_HIDDEN1, _PAD), jnp.float32)
           .at[:, :_HIDDEN2].set(w2).astype(mdt))
    b2p = jnp.zeros((1, _PAD), jnp.float32).at[:, :_HIDDEN2].set(b2)
    w3p = (jnp.zeros((_PAD, _PAD), jnp.float32)
           .at[:_HIDDEN2, :_OUT].set(w3).astype(mdt))
    return (w1.reshape(1, _HIDDEN1).astype(jnp.float32),
            b1.reshape(1, _HIDDEN1).astype(jnp.float32),
            w2p, b2p, w3p,
            b3.reshape(1, _OUT).astype(jnp.float32))


def _forward_prepared(x, prepared, *, max_tile=1024):
    """x: (B, 1) float32 -> (B, 24) float32."""
    w1, b1, w2p, b2p, w3p, b3 = prepared
    B = x.shape[0]
    # Batch tile: multiple of 8 (sublane), capped at max_tile.
    TB = min(max_tile, _round_up(B, 8))
    Bp = _round_up(B, TB)
    if Bp != B:
        x = jnp.pad(x, ((0, Bp - B), (0, 0)))

    batch_in = pl.BlockSpec((TB, _IN), lambda i: (i, 0))
    batch_out = pl.BlockSpec((TB, _OUT), lambda i: (i, 0))
    # Constant index maps -> weights/biases stay VMEM-resident across steps.
    const = lambda shape: pl.BlockSpec(shape, lambda i: (0, 0))

    out = pl.pallas_call(
        _mlp_kernel,
        out_shape=jax.ShapeDtypeStruct((Bp, _OUT), jnp.float32),
        grid=(Bp // TB,),
        in_specs=[
            batch_in,                   # x
            const((1, _HIDDEN1)),       # w1 (row)
            const((1, _HIDDEN1)),       # b1
            const((_HIDDEN1, _PAD)),    # w2 padded (maybe bf16)
            const((1, _PAD)),           # b2 padded
            const((_PAD, _PAD)),        # w3 padded (maybe bf16)
            const((1, _OUT)),           # b3 (narrow)
        ],
        out_specs=batch_out,
        compiler_params=pltpu.CompilerParams(
            dimension_semantics=("parallel",),   # megacore-shard the batch axis
        ),
    )(x, w1, b1, w2p, b2p, w3p, b3)

    # Only the batch-pad rows are sliced away; columns are already narrow.
    return out if Bp == B else out[:B]


def make_forward(params, *, max_tile=1024, mxu_bf16=True):
    """Pad params once and return a jitted forward(x) -> (B, 24)."""
    prepared = _prepare_params(params, mxu_bf16=mxu_bf16)

    @jax.jit
    def _fwd(x, prep):
        return _forward_prepared(x, prep, max_tile=max_tile)

    return lambda x: _fwd(x, prepared)


# ----------------------------------------------------------------------------
# Parameter init (matches the torch module: xavier_uniform weights, bias 0.01)
# ----------------------------------------------------------------------------
def _xavier_uniform(key, fan_in, fan_out):
    bound = math.sqrt(6.0 / (fan_in + fan_out))
    # stored as (in_features, out_features) so forward computes x @ W
    return jax.random.uniform(
        key, (fan_in, fan_out), dtype=jnp.float32, minval=-bound, maxval=bound
    )


def init_params(key):
    k1, k2, k3 = jax.random.split(key, 3)
    w1 = _xavier_uniform(k1, _IN, _HIDDEN1)
    b1 = jnp.full((1, _HIDDEN1), 0.01, dtype=jnp.float32)
    w2 = _xavier_uniform(k2, _HIDDEN1, _HIDDEN2)
    b2 = jnp.full((1, _HIDDEN2), 0.01, dtype=jnp.float32)
    w3 = _xavier_uniform(k3, _HIDDEN2, _OUT)
    b3 = jnp.full((1, _OUT), 0.01, dtype=jnp.float32)
    return (w1, b1, w2, b2, w3, b3)


def _reference_forward(x, params):
    """Pure-JAX reference of the PyTorch forward (full f32)."""
    w1, b1, w2, b2, w3, b3 = params
    # fc1 has in_features=1, so x @ w1 == x * w1 (outer product); use the same
    # formulation as the kernel so sin() does not amplify dot-precision noise.
    h1 = jnp.sin(x * w1 + b1)
    h2 = jax.nn.relu(
        jnp.dot(h1, w2, precision=jax.lax.Precision.HIGHEST) + b2)
    z = jnp.dot(h2, w3, precision=jax.lax.Precision.HIGHEST) + b3
    return jax.nn.sigmoid(z)


if __name__ == "__main__":
    key = jax.random.PRNGKey(0)
    pkey, xkey1, xkey2 = jax.random.split(key, 3)
    params = init_params(pkey)

    # generate_params-style batch of seed scalars (small shapes; moderate
    # magnitudes so sin() stays numerically well-conditioned for comparison).
    B = 8
    x = jax.random.normal(xkey1, (B, _IN), dtype=jnp.float32) * 3.0
    ref = _reference_forward(x, params)

    # Default fast path: bf16 MXU operands, f32 accumulate.
    fwd_bf16 = make_forward(params, mxu_bf16=True)
    out = jax.block_until_ready(fwd_bf16(x))
    assert out.shape == (B, _OUT)
    assert jnp.allclose(out, ref, atol=5e-2), float(jnp.max(jnp.abs(out - ref)))

    # Full-f32 MXU path: tighter parity with the reference.
    fwd_f32 = make_forward(params, mxu_bf16=False)
    out_f32 = jax.block_until_ready(fwd_f32(x))
    assert jnp.allclose(out_f32, ref, atol=5e-3), float(
        jnp.max(jnp.abs(out_f32 - ref)))

    # Non-tile-aligned, multi-grid-step batch exercises pipelining + padding.
    B2 = 1030
    x2 = jax.random.normal(xkey2, (B2, _IN), dtype=jnp.float32) * 3.0
    out2 = jax.block_until_ready(fwd_bf16(x2))
    ref2 = _reference_forward(x2, params)
    assert out2.shape == (B2, _OUT)
    assert jnp.allclose(out2, ref2, atol=5e-2), float(
        jnp.max(jnp.abs(out2 - ref2)))

    print("KERNEL_OK")
</pallas_src>

<mosaic_0001>
module attributes {stable_mosaic.version = 11 : i64} {
  func.func @_mlp_kernel(%arg0: i32, %arg1: memref<8x1xf32, #tpu.memory_space<vmem>>, %arg2: memref<1x128xf32, #tpu.memory_space<vmem>>, %arg3: memref<1x128xf32, #tpu.memory_space<vmem>>, %arg4: memref<128x128xbf16, #tpu.memory_space<vmem>>, %arg5: memref<1x128xf32, #tpu.memory_space<vmem>>, %arg6: memref<128x128xbf16, #tpu.memory_space<vmem>>, %arg7: memref<1x24xf32, #tpu.memory_space<vmem>>, %arg8: memref<8x24xf32, #tpu.memory_space<vmem>>) attributes {dimension_semantics = [#tpu.dimension_semantics<parallel>], iteration_bounds = array<i64: 1>, scalar_prefetch = 0 : i64, scratch_operands = 0 : i64, tpu.core_type = #tpu.core_type<tc>, window_params = [{transform_indices = @transform_0, window_bounds = array<i64: 8, 1>}, {pipeline_mode = #tpu.pipeline_mode<synchronous>, transform_indices = @transform_1, window_bounds = array<i64: 1, 128>}, {pipeline_mode = #tpu.pipeline_mode<synchronous>, transform_indices = @transform_2, window_bounds = array<i64: 1, 128>}, {pipeline_mode = #tpu.pipeline_mode<synchronous>, transform_indices = @transform_3, window_bounds = array<i64: 128, 128>}, {pipeline_mode = #tpu.pipeline_mode<synchronous>, transform_indices = @transform_4, window_bounds = array<i64: 1, 128>}, {pipeline_mode = #tpu.pipeline_mode<synchronous>, transform_indices = @transform_5, window_bounds = array<i64: 128, 128>}, {pipeline_mode = #tpu.pipeline_mode<synchronous>, transform_indices = @transform_6, window_bounds = array<i64: 1, 24>}, {transform_indices = @transform_7, window_bounds = array<i64: 8, 24>}]} {
    %c0 = arith.constant 0 : index
    %c0_0 = arith.constant 0 : index
    %0 = vector.load %arg1[%c0, %c0_0] : memref<8x1xf32, #tpu.memory_space<vmem>>, vector<8x1xf32>
    %c0_1 = arith.constant 0 : index
    %c0_2 = arith.constant 0 : index
    %1 = vector.load %arg2[%c0_1, %c0_2] : memref<1x128xf32, #tpu.memory_space<vmem>>, vector<1x128xf32>
    %2 = vector.broadcast %0 : vector<8x1xf32> to vector<8x128xf32>
    %3 = vector.broadcast %1 : vector<1x128xf32> to vector<8x128xf32>
    %4 = arith.mulf %2, %3 : vector<8x128xf32>
    %c0_3 = arith.constant 0 : index
    %c0_4 = arith.constant 0 : index
    %5 = vector.load %arg3[%c0_3, %c0_4] : memref<1x128xf32, #tpu.memory_space<vmem>>, vector<1x128xf32>
    %6 = vector.broadcast %5 : vector<1x128xf32> to vector<8x128xf32>
    %7 = arith.addf %4, %6 : vector<8x128xf32>
    %8 = math.sin %7 : vector<8x128xf32>
    %9 = arith.truncf %8 : vector<8x128xf32> to vector<8x128xbf16>
    %c0_5 = arith.constant 0 : index
    %c0_6 = arith.constant 0 : index
    %10 = vector.load %arg4[%c0_5, %c0_6] : memref<128x128xbf16, #tpu.memory_space<vmem>>, vector<128x128xbf16>
    %cst = arith.constant dense<0.000000e+00> : vector<8x128xf32>
    %11 = tpu.matmul %9, %10, %cst {dimension_numbers = #tpu.dot_dimension_numbers<[1], [0], [0], [1], [0, 0, 1, 1], [], []>} : vector<8x128xbf16>, vector<128x128xbf16>, vector<8x128xf32> -> vector<8x128xf32>
    %c0_7 = arith.constant 0 : index
    %c0_8 = arith.constant 0 : index
    %12 = vector.load %arg5[%c0_7, %c0_8] : memref<1x128xf32, #tpu.memory_space<vmem>>, vector<1x128xf32>
    %13 = vector.broadcast %12 : vector<1x128xf32> to vector<8x128xf32>
    %14 = arith.addf %11, %13 : vector<8x128xf32>
    %cst_9 = arith.constant 0.000000e+00 : f32
    %15 = vector.broadcast %cst_9 : f32 to vector<8x128xf32>
    %16 = arith.maximumf %14, %15 : vector<8x128xf32>
    %17 = arith.truncf %16 : vector<8x128xf32> to vector<8x128xbf16>
    %c0_10 = arith.constant 0 : index
    %c0_11 = arith.constant 0 : index
    %18 = vector.load %arg6[%c0_10, %c0_11] : memref<128x128xbf16, #tpu.memory_space<vmem>>, vector<128x128xbf16>
    %cst_12 = arith.constant dense<0.000000e+00> : vector<8x128xf32>
    %19 = tpu.matmul %17, %18, %cst_12 {dimension_numbers = #tpu.dot_dimension_numbers<[1], [0], [0], [1], [0, 0, 1, 1], [], []>} : vector<8x128xbf16>, vector<128x128xbf16>, vector<8x128xf32> -> vector<8x128xf32>
    %20 = vector.extract_strided_slice %19 {offsets = [0, 0], sizes = [8, 24], strides = [1, 1]} : vector<8x128xf32> to vector<8x24xf32>
    %c0_13 = arith.constant 0 : index
    %c0_14 = arith.constant 0 : index
    %21 = vector.load %arg7[%c0_13, %c0_14] : memref<1x24xf32, #tpu.memory_space<vmem>>, vector<1x24xf32>
    %22 = vector.broadcast %21 : vector<1x24xf32> to vector<8x24xf32>
    %23 = arith.addf %20, %22 : vector<8x24xf32>
    %24 = arith.negf %23 : vector<8x24xf32>
    %25 = math.exp %24 : vector<8x24xf32>
    %cst_15 = arith.constant 1.000000e+00 : f32
    %26 = vector.broadcast %cst_15 : f32 to vector<8x24xf32>
    %27 = arith.addf %26, %25 : vector<8x24xf32>
    %28 = arith.divf %26, %27 : vector<8x24xf32>
    %c0_16 = arith.constant 0 : index
    %c0_17 = arith.constant 0 : index
    %29 = vector.load %arg8[%c0_16, %c0_17] : memref<8x24xf32, #tpu.memory_space<vmem>>, vector<8x24xf32>
    tpu.vector_store %arg8[%c0_16, %c0_17], %28 {strides = array<i32>} : memref<8x24xf32, #tpu.memory_space<vmem>>, vector<8x24xf32>,
    return
  }
  func.func @transform_0(%arg0: i32) -> (i32, i32) {
    %c0_i32 = arith.constant 0 : i32
    %c0_i32_0 = arith.constant 0 : i32
    return %arg0, %c0_i32 : i32, i32
  }
  func.func @transform_1(%arg0: i32) -> (i32, i32) {
    %c0_i32 = arith.constant 0 : i32
    %c0_i32_0 = arith.constant 0 : i32
    %c0_i32_1 = arith.constant 0 : i32
    return %c0_i32, %c0_i32_0 : i32, i32
  }
  func.func @transform_2(%arg0: i32) -> (i32, i32) {
    %c0_i32 = arith.constant 0 : i32
    %c0_i32_0 = arith.constant 0 : i32
    %c0_i32_1 = arith.constant 0 : i32
    return %c0_i32, %c0_i32_0 : i32, i32
  }
  func.func @transform_3(%arg0: i32) -> (i32, i32) {
    %c0_i32 = arith.constant 0 : i32
    %c0_i32_0 = arith.constant 0 : i32
    %c0_i32_1 = arith.constant 0 : i32
    return %c0_i32, %c0_i32_0 : i32, i32
  }
  func.func @transform_4(%arg0: i32) -> (i32, i32) {
    %c0_i32 = arith.constant 0 : i32
    %c0_i32_0 = arith.constant 0 : i32
    %c0_i32_1 = arith.constant 0 : i32
    return %c0_i32, %c0_i32_0 : i32, i32
  }
  func.func @transform_5(%arg0: i32) -> (i32, i32) {
    %c0_i32 = arith.constant 0 : i32
    %c0_i32_0 = arith.constant 0 : i32
    %c0_i32_1 = arith.constant 0 : i32
    return %c0_i32, %c0_i32_0 : i32, i32
  }
  func.func @transform_6(%arg0: i32) -> (i32, i32) {
    %c0_i32 = arith.constant 0 : i32
    %c0_i32_0 = arith.constant 0 : i32
    %c0_i32_1 = arith.constant 0 : i32
    return %c0_i32, %c0_i32_0 : i32, i32
  }
  func.func @transform_7(%arg0: i32) -> (i32, i32) {
    %c0_i32 = arith.constant 0 : i32
    %c0_i32_0 = arith.constant 0 : i32
    return %arg0, %c0_i32 : i32, i32
  }
}

</mosaic_0001>

<bundles_post_ra>
// kernel: _fwd.1
= control target key start
LH: loop header
LB: loop body
LE: loop exit
PB: predicated region body
PF: predicated region fallthrough
CT: control target
= control target key end

     0   :  { %12 = vsyncpa [#allocation3], 0  ;;  %s774_s0 = inlined_call_operand.vmem [shape: f32[8,1], index: 0, kind: input, shape index: {}]   ;;  %s775_s1 = inlined_call_operand.vmem [shape: f32[1,128], index: 1, kind: input, shape index: {}]   ;;  %s776_s2 = inlined_call_operand.vmem [shape: f32[1,128], index: 2, kind: input, shape index: {}]   ;;  %s777_s3 = inlined_call_operand.hbm [shape: bf16[128,128], index: 3, kind: input, shape index: {}]   ;;  %s778_s4 = inlined_call_operand.vmem [shape: f32[1,128], index: 4, kind: input, shape index: {}]   ;;  %s779_s5 = inlined_call_operand.hbm [shape: bf16[128,128], index: 5, kind: input, shape index: {}]   ;;  %s780_s6 = inlined_call_operand.vmem [shape: f32[1,24], index: 6, kind: input, shape index: {}]   ;;  %s781_s7 = inlined_call_operand.hbm [shape: f32[8,24], index: 7, kind: output, shape index: {}]  }
   0x1   :  { %13 = vsyncpa [#allocation6], 0 }
   0x2   :  { %14 = vsyncpa [#allocation4], 0  ;;  %s630_s24 = smov [#allocation2]   ;;  %s558_s28 = scalar_lea.hbm %s777_s3, 1024 }
   0x3   :  { %s26_s25 = sshll.u32 %s630_s24, 4  ;;  %p559_p0 = scmp.ne.s32.totalorder %s777_s3, %s558_s28  ;;  %s27_s25 = int_to_ptr.vmem [resolvable:$true] %s26_s25 }
   0x4   :  { %p562_p1 = scmp.lt.u32.totalorder %s558_s28, %s777_s3 }
   0x6   :  { %p564_p2 = pnand %p562_p1, %p559_p0 }
   0x8   :  { %567 = shalt.err (!%p564_p2)
}
   0x9   :  { %s568_s10 = scalar_lea.vmem %s27_s25, 1024  ;;  %p573_p4 = scmp.lt.s32.totalorder %s27_s25, %s27_s25 }
   0xa   :  { %p569_p3 = scmp.ne.s32.totalorder %s27_s25, %s568_s10  ;;  %p574_p5 = scmp.lt.s32.totalorder %s568_s10, %s568_s10 }
   0xc   :  { %p575_p6 = por %p574_p5, %p573_p4 }
   0xe   :  { %p576_p7 = pnand %p575_p6, %p569_p3 }
  0x10   :  { %579 = shalt.err (!%p576_p7)
}
  0x11   :  { %s631_s11 = smov 64   ;;  %s632_s12 = smov 4  }
  0x12   :  { %32 = dma.hbm_to_vmem [thread:$0]  %s777_s3, 1024, %s27_s25, [#allocation3], %s631_s11, %s631_s11, %s632_s12  }
  0x13   :  { %s633_s15 = smov [#allocation5]   ;;  %s580_s19 = scalar_lea.hbm %s779_s5, 1024 }
  0x14   :  { %s40_s16 = sshll.u32 %s633_s15, 4  ;;  %p581_p8 = scmp.ne.s32.totalorder %s779_s5, %s580_s19  ;;  %s41_s16 = int_to_ptr.vmem [resolvable:$true] %s40_s16 }
  0x15   :  { %p584_p9 = scmp.lt.u32.totalorder %s580_s19, %s779_s5 }
  0x17   :  { %p586_p10 = pnand %p584_p9, %p581_p8 }
  0x19   :  { %589 = shalt.err (!%p586_p10)
}
  0x1a   :  { %s590_s24 = scalar_lea.vmem %s41_s16, 1024  ;;  %p595_p12 = scmp.lt.s32.totalorder %s41_s16, %s41_s16 }
  0x1b   :  { %p591_p11 = scmp.ne.s32.totalorder %s41_s16, %s590_s24  ;;  %p596_p13 = scmp.lt.s32.totalorder %s590_s24, %s590_s24 }
  0x1d   :  { %p597_p0 = por %p596_p13, %p595_p12 }
  0x1f   :  { %p598_p1 = pnand %p597_p0, %p591_p11 }
  0x21   :  { %601 = shalt.err (!%p598_p1)
}
  0x22   :  { %46 = dma.hbm_to_vmem [thread:$0]  %s779_s5, 1024, %s41_s16, [#allocation6], %s631_s11, %s631_s11, %s632_s12  }
  0x23   :  { %624 = dma.done.wait [#allocation3], 1024  }
  0x24   :  { %625 = vsyncadd [#allocation3], 4294966272 }
  0x25   :  { %626 = dma.done.wait [#allocation6], 1024  }
  0x26   :  { %627 = vsyncadd [#allocation6], 4294966272  ;;  %v634_v0 = vmov 0   ;;  %v56_v1 = vld [vmem:[%s774_s0] sm:$0xff]  ;;  %v635_v3 = vmov 0.0   ;;  %v535_v4 = vld [vmem:[#allocation2 + $0x8] sm:$0xff]  }
  0x27   :  { %533 = vset.pattern.permute.xlu0 %v634_v0  ;;  %v534_v2 = vld [vmem:[#allocation2] sm:$0xff]   ;;  %475 = vmatprep.subr.bf16.mxu0 %v635_v3  ;;  %v536_v5 = vld [vmem:[#allocation2 + $0x10] sm:$0xff]   ;;  %v537_v6 = vld [vmem:[#allocation2 + $0x18] sm:$0xff]   ;;  %vm636_vm0 = vmmov 0   ;;  %v637_v32 = vmov 683565275  }
  0x28   :  { %60 = vperm.xlu0 %533, %v56_v1   ;;  %495 = vmatprep.subr.bf16.mxu1 %v635_v3  ;;  %v538_v7 = vld [vmem:[#allocation2 + $0x20] sm:$0xff]   ;;  %v539_v8 = vld [vmem:[#allocation2 + $0x28] sm:$0xff]   ;;  %v540_v9 = vld [vmem:[#allocation2 + $0x30] sm:$0xff]   ;;  %v638_v34 = vmov 2475754826   ;;  %vm414_vm14 = vcmask 195584  }
  0x29   :  { %476 = vmatpush3.bf16.msra.mxu0 %v534_v2  ;;  %491 = vmatprep.mubr.msk.bf16.mxu0 %vm636_vm0, %v635_v3  ;;  %v541_v10 = vld [vmem:[#allocation2 + $0x38] sm:$0xff]   ;;  %v542_v11 = vld [vmem:[#allocation5] sm:$0xff]   ;;  %v543_v12 = vld [vmem:[#allocation5 + $0x8] sm:$0xff]   ;;  %v639_v37 = vmov 2131351028  }
  0x2a   :  { %477 = vmatprep.subr.bf16.mxu0 %v635_v3  ;;  %511 = vmatprep.mubr.msk.bf16.mxu1 %vm636_vm0, %v635_v3  ;;  %v544_v13 = vld [vmem:[#allocation5 + $0x10] sm:$0xff]   ;;  %v545_v14 = vld [vmem:[#allocation5 + $0x18] sm:$0xff]   ;;  %v546_v15 = vld [vmem:[#allocation5 + $0x20] sm:$0xff]   ;;  %v640_v40 = vmov 2102212464  }
  0x2b   :  { %496 = vmatpush3.bf16.msra.mxu1 %v542_v11  ;;  %v547_v16 = vld [vmem:[#allocation5 + $0x28] sm:$0xff]   ;;  %v432_v17 = vld [vmem:[%s775_s1] ss:$0 sm:$0xff]  ;;  %v641_v43 = vmov 920167782  }
  0x2c   :  { %497 = vmatprep.subr.bf16.mxu1 %v635_v3  ;;  %v433_v18 = vld [vmem:[%s776_s2] ss:$0 sm:$0xff]  ;;  %v642_v46 = vmov 1326507024  }
  0x2d   :  { %478 = vmatpush3.bf16.msra.mxu0 %v535_v4 }
  0x2e   :  { %479 = vmatprep.subr.bf16.mxu0 %v635_v3 }
  0x2f   :  { %498 = vmatpush3.bf16.msra.mxu1 %v543_v12 }
  0x30   :  { %499 = vmatprep.subr.bf16.mxu1 %v635_v3 }
  0x31   :  { %480 = vmatpush3.bf16.msra.mxu0 %v536_v5 }
  0x32   :  { %481 = vmatprep.subr.bf16.mxu0 %v635_v3 }
  0x33   :  { %500 = vmatpush3.bf16.msra.mxu1 %v544_v13 }
  0x34   :  { %501 = vmatprep.subr.bf16.mxu1 %v635_v3 }
  0x35   :  { %482 = vmatpush3.bf16.msra.mxu0 %v537_v6 }
  0x36   :  { %483 = vmatprep.subr.bf16.mxu0 %v635_v3 }
  0x37   :  { %502 = vmatpush3.bf16.msra.mxu1 %v545_v14 }
  0x38   :  { %503 = vmatprep.subr.bf16.mxu1 %v635_v3 }
  0x39   :  { %484 = vmatpush3.bf16.msra.mxu0 %v538_v7 }
  0x3a   :  { %485 = vmatprep.subr.bf16.mxu0 %v635_v3 }
  0x3b   :  { %504 = vmatpush3.bf16.msra.mxu1 %v546_v15 }
  0x3c   :  { %505 = vmatprep.subr.bf16.mxu1 %v635_v3 }
  0x3d   :  { %486 = vmatpush3.bf16.msra.mxu0 %v539_v8 }
  0x3e   :  { %487 = vmatprep.subr.bf16.mxu0 %v635_v3 }
  0x3f   :  { %506 = vmatpush3.bf16.msra.mxu1 %v547_v16 }
  0x40   :  { %507 = vmatprep.subr.bf16.mxu1 %v635_v3 }
  0x41   :  { %488 = vmatpush3.bf16.msra.mxu0 %v540_v9 }
  0x42   :  { %489 = vmatprep.subr.bf16.mxu0 %v635_v3 }
  0x45   :  { %490 = vmatpush3.bf16.msra.mxu0 %v541_v10 }
  0xa7   :  { %v61_v19 = vpop.permute.xlu0 %60 }
  0xa8   :  { %v69_v20 = vmul.f32 %v432_v17, %v61_v19 }
  0xaa   :  { %v734_v21 = vadd.f32 %v433_v18, %v69_v20 }
  0xac   :  { %v81_v22 = vand.u32 2139095040, %v734_v21  ;;  %v78_v26 = vand.u32 2147483647, %v734_v21  ;;  %vm80_vm8 = vcmp.lt.s32.totalorder %v734_v21, 0  ;;  %vm170_vm13 = vweird.f32 %v734_v21 }
  0xae   :  { %v82_v23 = vshrl.u32 %v81_v22, 23  ;;  %v85_v29 = vand.u32 8388607, %v78_v26  ;;  %vm79_vm9 = vcmp.le.f32.partialorder %v78_v26, 0.7853982 }
  0xb0   :  { %v434_v24 = vadd.s32 4294967169, %v82_v23  ;;  %v86_v48 = vor.u32 8388608, %v85_v29 }
  0xb2   :  { %v88_v25 = vadd.s32 1, %v434_v24  ;;  %v126_v62 = vshll.u32 %v86_v48, 8 }
  0xb4   :  { %vm89_vm1 = vcmp.gt.s32.totalorder %v88_v25, 0 }
  0xb5   :  { %v90_v27 = vsel %vm89_vm1, %v88_v25, 0 }
  0xb6   :  { %v92_v28 = vand.u32 31, %v90_v27  ;;  %v91_v31 = vshrl.u32 %v90_v27, 5 }
  0xb8   :  { %v93_v30 = vsub.s32 32, %v92_v28  ;;  %v95_v33 = vshll.u32 %v637_v32, %v92_v28  ;;  %v98_v35 = vshll.u32 %v638_v34, %v92_v28  ;;  %v101_v39 = vshll.u32 %v639_v37, %v92_v28 }
  0xb9   :  { %v104_v42 = vshll.u32 %v640_v40, %v92_v28  ;;  %v107_v45 = vshll.u32 %v641_v43, %v92_v28  ;;  %vm110_vm2 = vcmp.lt.s32.totalorder %v91_v31, 1  ;;  %vm113_vm3 = vcmp.lt.s32.totalorder %v91_v31, 4 }
  0xba   :  { %v96_v36 = vshrl.u32 %v638_v34, %v93_v30  ;;  %v99_v38 = vshrl.u32 %v639_v37, %v93_v30  ;;  %v102_v41 = vshrl.u32 %v640_v40, %v93_v30  ;;  %v105_v44 = vshrl.u32 %v641_v43, %v93_v30 }
  0xbb   :  { %v108_v47 = vshrl.u32 %v642_v46, %v93_v30  ;;  %v94_v57 = vshrl.u32 %v637_v32, %v93_v30  ;;  %vm112_vm4 = vcmp.lt.s32.totalorder %v91_v31, 3  ;;  %vm111_vm5 = vcmp.lt.s32.totalorder %v91_v31, 2 }
  0xbc   :  { %v97_v49 = vor.u32 %v96_v36, %v95_v33  ;;  %v100_v50 = vor.u32 %v99_v38, %v98_v35  ;;  %v103_v51 = vor.u32 %v102_v41, %v101_v39  ;;  %v106_v52 = vor.u32 %v105_v44, %v104_v42 }
  0xbd   :  { %v109_v53 = vor.u32 %v108_v47, %v107_v45 }
  0xbe   :  { %v115_v54 = vsel %vm113_vm3, %v103_v51, 2102212464  ;;  %v118_v55 = vsel %vm110_vm2, %v97_v49, %v100_v50  ;;  %v122_v56 = vsel %vm110_vm2, %v100_v50, %v103_v51  ;;  %v119_v58 = vsel %vm113_vm3, %v106_v52, 920167782 }
  0xbf   :  { %v123_v59 = vsel %vm113_vm3, %v109_v53, 1326507024  ;;  %v120_v60 = vsel %vm112_vm4, %v103_v51, %v119_v58  ;;  %v114_v63 = vsel %vm110_vm2, %v94_v57, %v97_v49  ;;  %v116_v0 = vsel %vm112_vm4, %v100_v50, %v115_v54  ;;  %v549_v53 = vld [vmem:[#allocation5 + $0x38] sm:$0xff]   ;;  %v438_v54 = vld [vmem:[%s778_s4] ss:$0 sm:$0xff]  ;;  %s643_s4 = smov [#allocation7]  }
  0xc0   :  { %v124_v61 = vsel %vm112_vm4, %v106_v52, %v123_v59  ;;  %v121_v1 = vsel %vm111_vm5, %v118_v55, %v120_v60  ;;  %v117_v8 = vsel %vm111_vm5, %v114_v63, %v116_v0  ;;  %v548_v52 = vld [vmem:[#allocation5 + $0x30] sm:$0xff]   ;;  %s422_s9 = sshll.u32 %s643_s4, 4  ;;  %s423_s9 = int_to_ptr.vmem [resolvable:$true] %s422_s9 }
  0xc1   :  { %v125_v2 = vsel %vm111_vm5, %v122_v56, %v124_v61  ;;  %v743_v6 = vmul.u32.u64.low %v126_v62, %v121_v1  ;;  %v744_v7 = vmul.u32.u64.high %v126_v62, %v121_v1, %v743_v6  ;;  %v133_v10 = vmul.u32 %v126_v62, %v117_v8  ;;  %508 = vmatpush3.bf16.msra.mxu1 %v548_v52  ;;  %v455_v61 = vld [vmem:[%s780_s6] ss:$0 sm:$0xff]  ;;  %s602_s10 = scalar_lea.vmem %s423_s9, 128  ;;  %p607_p3 = scmp.lt.s32.totalorder %s423_s9, %s423_s9 }
  0xc2   :  { %v740_v4 = vmul.u32.u64.low %v126_v62, %v125_v2  ;;  %v741_v5 = vmul.u32.u64.high %v126_v62, %v125_v2, %v740_v4  ;;  %509 = vmatprep.subr.bf16.mxu1 %v635_v3  ;;  %p603_p2 = scmp.ne.s32.totalorder %s423_s9, %s602_s10  ;;  %p608_p4 = scmp.lt.s32.totalorder %s602_s10, %s602_s10 }
  0xc3   :  { %v136_v9 = vadd.s32 1, %v744_v7 }
  0xc4   :  { %vm135_vm6 = vc.u32 %v741_v5, %v743_v6  ;;  %v134_v23 = vadd.s32 %v743_v6, %v741_v5  ;;  %p609_p5 = por %p608_p4, %p607_p3 }
  0xc5   :  { %v137_v11 = vsel %vm135_vm6, %v136_v9, %v744_v7  ;;  %510 = vmatpush3.bf16.msra.mxu1 %v549_v53 }
  0xc6   :  { %v138_v12 = vadd.s32 %v137_v11, %v133_v10  ;;  %p610_p6 = pnand %p609_p5, %p603_p2 }
  0xc8   :  { %v139_v13 = vadd.s32 536870912, %v138_v12 }
  0xca   :  { %v140_v14 = vshrl.u32 %v139_v13, 30 }
  0xcc   :  { %v141_v15 = vshll.u32 %v140_v14, 30  ;;  %v164_v36 = vsub.s32 4, %v140_v14 }
  0xce   :  { %v142_v16 = vsub.s32 %v138_v12, %v141_v15  ;;  %v165_v39 = vsel %vm80_vm8, %v164_v36, %v140_v14 }
  0xcf   :  { %v167_v41 = vsel %vm79_vm9, 0, %v165_v39 }
  0xd0   :  { %v144_v17 = vsub.s32 0, %v142_v16  ;;  %v171_v42 = vadd.s32 3, %v167_v41 }
  0xd2   :  { %v435_v18 = vmin.u32 %v144_v17, %v142_v16  ;;  %v172_v43 = vand.u32 3, %v171_v42 }
  0xd4   :  { %v146_v19 = vclz %v435_v18  ;;  %vm177_vm10 = vcmp.eq.s32.totalorder %v172_v43, 2  ;;  %vm174_vm11 = vcmp.eq.s32.totalorder %v172_v43, 0  ;;  %vm173_vm12 = vcmp.lt.s32.totalorder %v172_v43, 2 }
  0xd6   :  { %v436_v20 = vadd.s32 4294967294, %v146_v19 }
  0xd8   :  { %vm437_vm7 = vcmp.lt.s32.totalorder %v436_v20, 0 }
  0xd9   :  { %v149_v22 = vsel %vm437_vm7, 0, %v436_v20 }
  0xda   :  { %v150_v24 = vsub.s32 32, %v149_v22  ;;  %v154_v25 = vsub.s32 4294967266, %v149_v22  ;;  %v151_v27 = vshll.u32 %v142_v16, %v149_v22 }
  0xdc   :  { %v152_v28 = vshrl.u32 %v134_v23, %v150_v24  ;;  %v155_v29 = vadd.s32 127, %v154_v25 }
  0xde   :  { %v153_v30 = vor.u32 %v152_v28, %v151_v27  ;;  %v156_v31 = vshll.u32 %v155_v29, 23 }
  0xe0   :  { %v157_v32 = vor.u32 4788187, %v156_v31  ;;  %v160_v34 = vcvt.s32.f32 %v153_v30 }
  0xe2   :  { %v158_v33 = vand.u32 2147483647, %v157_v32 }
  0xe4   :  { %v161_v35 = vmul.f32 %v160_v34, %v158_v33 }
  0xe6   :  { %v162_v37 = vxor.u32 2147483648, %v161_v35 }
  0xe8   :  { %v163_v38 = vsel %vm80_vm8, %v162_v37, %v161_v35 }
  0xe9   :  { %v166_v40 = vsel %vm79_vm9, %v734_v21, %v163_v38 }
  0xea   :  { %550 = vcosq.f32 %v166_v40 }
  0xeb   :  { %552 = vsinq.f32 %v166_v40 }
  0xf4   :  { %v551_v44 = vpop.eup %550 }
  0xf5   :  { %v553_v45 = vpop.eup %552  ;;  %v178_v46 = vxor.u32 2147483648, %v551_v44 }
  0xf6   :  { %v175_v47 = vxor.u32 2147483648, %v553_v45 }
  0xf7   :  { %v179_v48 = vsel %vm177_vm10, %v178_v46, %v553_v45 }
  0xf8   :  { %v176_v49 = vsel %vm174_vm11, %v551_v44, %v175_v47 }
  0xf9   :  { %v180_v26 = vsel %vm173_vm12, %v176_v49, %v179_v48 }
  0xfa   :  { %v181_v50 = vsel %vm170_vm13, nan, %v180_v26 }
  0xfb   :  { %v182_v51 = vpack.c.bf16 %v181_v50, %v181_v50 }
  0xfd   :  { %492 = vmatmul.mubr.bf16.vlgmr.msra.gmra.mrb[0].mxu0 %v182_v51 }
 0x1d0   :  { %v288_v55 = vpop.f32.mrb[0].mxu0 }
 0x1d1   :  { %v289_v56 = vadd.f32 %v438_v54, %v288_v55  ;;  %v493_v57 = vpop.f32.mrb[1].mxu0 }
 0x1d2   :  { %v291_v58 = vpop.f32.mrb[2].mxu0 }
 0x1d3   :  { %v294_v59 = vmax.f32 %v289_v56, 0.0  ;;  %v494_v21 = vpop.f32.mrb[3].mxu0 }
 0x1d5   :  { %v295_v60 = vpack.c.bf16 %v294_v59, %v294_v59 }
 0x1d7   :  { %512 = vmatmul.mubr.bf16.vlgmr.msra.gmra.mrb[0].mxu1 %v295_v60 }
 0x2aa   :  { %v394_v62 = vpop.f32.mrb[0].mxu1 }
 0x2ab   :  { %v407_v3 = vadd.f32 %v455_v61, %v394_v62  ;;  %v513_v63 = vpop.f32.mrb[1].mxu1 }
 0x2ac   :  { %v397_v0 = vpop.f32.mrb[2].mxu1 }
 0x2ad   :  { %v456_v1 = vmul.f32 -1.442695, %v407_v3  ;;  %v514_v2 = vpop.f32.mrb[3].mxu1 }
 0x2af   :  { %554 = vpow2.f32 %v456_v1 }
 0x2b9   :  { %v555_v4 = vpop.eup %554 }
 0x2ba   :  { %v411_v5 = vadd.f32 1.0, %v555_v4 }
 0x2bc   :  { %556 = vrcp.f32 %v411_v5 }
 0x2c6   :  { %v557_v6 = vpop.eup %556 }
 0x2c7   :  { %415 = vst.msk [vmem:[#allocation7] sm:$0xff] %vm414_vm14, %v557_v6 }
 0x2c8   :  { %613 = shalt.err (!%p610_p6)
}
 0x2c9   :  { %s614_s12 = scalar_lea.hbm %s781_s7, 128 }
 0x2ca   :  { %p615_p7 = scmp.ne.s32.totalorder %s781_s7, %s614_s12  ;;  %p618_p8 = scmp.lt.u32.totalorder %s614_s12, %s781_s7 }
 0x2cc   :  { %p620_p9 = pnand %p618_p8, %p615_p7 }
 0x2ce   :  { %623 = shalt.err (!%p620_p9)
}
 0x2cf   :  { %425 = dma.vmem_to_hbm [thread:$0]  %s423_s9, 128, %s781_s7, [#allocation4]  }
 0x2d0   :  { %628 = dma.done.wait [#allocation4], 128  }
 0x2d1   :  { %629 = vsyncadd [#allocation4], 4294967168 }
 0x2d2   :  { %429 = vsyncpa [#allocation3], 1 }
 0x2d3   :  { %430 = vsyncpa [#allocation6], 1 }
 0x2d4   :  { %431 = vsyncpa [#allocation4], 1 }

</bundles_post_ra>
